<compile_context>
chip_gen: v7x
topology: tpu7x:2x2x1
jax: 0.10.0
libtpu: 0.0.40
codegen_flags: <defaults>
</compile_context>

<pallas_src>
import functools

import jax
import jax.numpy as jnp
from jax.experimental import pallas as pl
from jax.experimental.pallas import tpu as pltpu


_VMEM_LIMIT_BYTES = 32 * 1024 * 1024   # <= scoped defaults on v6e/v7x, < physical everywhere
_VMEM_TILE_BUDGET = 16 * 1024 * 1024   # headroom for pipeline buffers + f32 temporaries


def _round_up(x, m):
    return (x + m - 1) // m * m


def _pick_tile_n(n, c, itemsize):
    """Batch-tile size (multiple of 16, 256-1024 sweet spot) sized so the
    double-buffered input stream plus the f32 working set stays well inside
    VMEM on every generation, including v7x's 64 MiB."""
    per_row = 2 * c * itemsize        # logits, double-buffered, native dtype
    per_row += 3 * c * 4              # in-kernel f32 temporaries (x, e, masked e)
    per_row += 8 * 4                  # (N, 1) columns: targets / weights / loss
    tile = _VMEM_TILE_BUDGET // max(per_row, 1)
    tile = max(16, min(1024, (tile // 16) * 16))
    return min(tile, _round_up(n, 16))


def _truncated_loss_kernel(logits_ref, targets_ref, w_ref, out_ref, acc_ref,
                           *, q, k_pow_q, n_true, tile_n):
    i = pl.program_id(0)

    # zero the resident accumulator on the first tile
    @pl.when(i == 0)
    def _():
        acc_ref[...] = jnp.zeros_like(acc_ref)

    # stream native dtype (e.g. bf16) from HBM, upcast on-chip; keep all
    # transcendental math in f32 (required on v5e, harmless elsewhere).
    x = logits_ref[...].astype(jnp.float32)                 # (TILE_N, C)
    tn, c = x.shape

    # un-normalized softmax: gather the target's exp, one reciprocal per row
    m = jnp.max(x, axis=-1, keepdims=True)                  # (TILE_N, 1)
    e = jnp.exp(x - m)                                       # (TILE_N, C)
    denom = jnp.sum(e, axis=-1, keepdims=True)               # (TILE_N, 1)

    cls = jax.lax.broadcasted_iota(jnp.int32, (tn, c), 1)
    onehot = cls == targets_ref[...]                         # (TILE_N, C) via (TILE_N,1) bcast
    yg_e = jnp.sum(jnp.where(onehot, e, 0.0), axis=-1, keepdims=True)
    yg = yg_e * pl.reciprocal(denom, approx=True)            # EUP slot, no (N,C) divide

    # folded loss:  (1-yg^q)/q*w - (1-k^q)/q*w  ==  w*(k^q - yg^q)/q
    w = w_ref[...].astype(jnp.float32)                       # (TILE_N, 1)
    loss = w * ((k_pow_q - jnp.power(yg, q)) * (1.0 / q))

    # mask batch-padding rows of the (possibly ragged) last tile
    row = i * tile_n + jax.lax.broadcasted_iota(jnp.int32, (tn, 1), 0)
    loss = jnp.where(row < n_true, loss, 0.0)

    acc_ref[...] = acc_ref[...] + jnp.sum(loss)

    # finalize: mean over the TRUE batch size, single (1,1) store
    @pl.when(i == pl.num_programs(0) - 1)
    def _():
        out_ref[...] = acc_ref[...] * (1.0 / n_true)


def truncated_loss(logits, targets, indexes, weight, *, q=0.7, k=0.5, tile_n=None):
    """Pallas implementation of TruncatedLoss.forward.

    logits:  (N, C) float (native dtype streamed from HBM, e.g. bf16)
    targets: (N,)   int   — class index per row
    indexes: (N,)   int   — row index into the trainset-sized weight table
    weight:  (trainset_size, 1) float (non-trainable parameter, ones at init)
    """
    n, c = logits.shape
    # glue: trainset-sized parameter-table lookup stays in plain JAX
    w_sel = weight[indexes].reshape(n, 1).astype(jnp.float32)
    t2 = targets.astype(jnp.int32).reshape(n, 1)

    if tile_n is None:
        tile_n = _pick_tile_n(n, c, jnp.dtype(logits.dtype).itemsize)
    tile_n = max(16, _round_up(int(tile_n), 16))

    n_pad = _round_up(n, tile_n)
    if n_pad != n:
        pad = n_pad - n
        logits = jnp.pad(logits, ((0, pad), (0, 0)))
        t2 = jnp.pad(t2, ((0, pad), (0, 0)))
        w_sel = jnp.pad(w_sel, ((0, pad), (0, 0)))
    num_blocks = n_pad // tile_n

    kernel = functools.partial(
        _truncated_loss_kernel,
        q=float(q), k_pow_q=float(k) ** float(q), n_true=n, tile_n=tile_n)

    out = pl.pallas_call(
        kernel,
        out_shape=jax.ShapeDtypeStruct((1, 1), jnp.float32),
        grid_spec=pltpu.PrefetchScalarGridSpec(
            num_scalar_prefetch=0,
            grid=(num_blocks,),
            in_specs=[
                pl.BlockSpec((tile_n, c), lambda i: (i, 0)),   # logits, native dtype
                pl.BlockSpec((tile_n, 1), lambda i: (i, 0)),   # targets (N,1) int32
                pl.BlockSpec((tile_n, 1), lambda i: (i, 0)),   # weight[indexes] f32
            ],
            out_specs=pl.BlockSpec((1, 1), lambda i: (0, 0)),  # resident scalar output
            scratch_shapes=[pltpu.VMEM((1, 1), jnp.float32)],  # f32 accumulator
        ),
        compiler_params=pltpu.CompilerParams(
            dimension_semantics=("arbitrary",),   # batch axis carries the reduction
            vmem_limit_bytes=_VMEM_LIMIT_BYTES,
        ),
    )(logits, t2, w_sel)
    return out[0, 0]


if __name__ == "__main__":
    key = jax.random.PRNGKey(0)
    N, C, TRAINSET = 20, 16, 64   # N not a multiple of the tile -> exercises padding/masking
    Q, K = 0.7, 0.5

    k_logits, k_targets, k_indexes = jax.random.split(key, 3)
    logits = jax.random.normal(k_logits, (N, C), dtype=jnp.float32).astype(jnp.bfloat16)
    targets = jax.random.randint(k_targets, (N,), 0, C, dtype=jnp.int32)
    indexes = jax.random.randint(k_indexes, (N,), 0, TRAINSET, dtype=jnp.int32)
    # module __init__: weight = ones(trainset_size, 1), requires_grad=False
    weight = jnp.ones((TRAINSET, 1), dtype=jnp.float32)

    # multi-tile path (3 grid steps, ragged last tile)
    loss = truncated_loss(logits, targets, indexes, weight, q=Q, k=K, tile_n=16)
    jax.block_until_ready(loss)
    # auto tile-size path
    loss_auto = truncated_loss(logits, targets, indexes, weight, q=Q, k=K)
    jax.block_until_ready(loss_auto)

    # plain-JAX reference (same math as the PyTorch forward), from the same bf16 logits
    p = jax.nn.softmax(logits.astype(jnp.float32), axis=1)
    yg = jnp.take_along_axis(p, targets[:, None], axis=1)
    w = weight[indexes]
    ref = jnp.mean((1 - yg ** Q) / Q * w - (1 - K ** Q) / Q * w)

    assert jnp.allclose(loss, ref, rtol=1e-2, atol=1e-3), (loss, ref)
    assert jnp.allclose(loss_auto, ref, rtol=1e-2, atol=1e-3), (loss_auto, ref)

    print("KERNEL_OK")
</pallas_src>

<mosaic_0001>
module attributes {stable_mosaic.version = 11 : i64} {
  func.func @_truncated_loss_kernel(%arg0: i32, %arg1: memref<16x16xbf16, #tpu.memory_space<vmem>>, %arg2: memref<16x1xi32, #tpu.memory_space<vmem>>, %arg3: memref<16x1xf32, #tpu.memory_space<vmem>>, %arg4: memref<1x1xf32, #tpu.memory_space<vmem>>, %arg5: memref<1x1xf32, #tpu.memory_space<vmem>>) attributes {dimension_semantics = [#tpu.dimension_semantics<arbitrary>], iteration_bounds = array<i64: 2>, scalar_prefetch = 0 : i64, scratch_operands = 1 : i64, tpu.core_type = #tpu.core_type<tc>, window_params = [{transform_indices = @transform_0, window_bounds = array<i64: 16, 16>}, {transform_indices = @transform_1, window_bounds = array<i64: 16, 1>}, {transform_indices = @transform_2, window_bounds = array<i64: 16, 1>}, {pipeline_mode = #tpu.pipeline_mode<synchronous>, transform_indices = @transform_3, window_bounds = array<i64: 1, 1>}]} {
    %c0_i32 = arith.constant 0 : i32
    %0 = arith.cmpi eq, %arg0, %c0_i32 : i32
    %1 = arith.extui %0 : i1 to i32
    %c0_i32_0 = arith.constant 0 : i32
    %2 = arith.cmpi ne, %1, %c0_i32_0 : i32
    scf.if %2 {
      %cst_19 = arith.constant 0.000000e+00 : f32
      %49 = vector.broadcast %cst_19 : f32 to vector<1x1xf32>
      %c0_20 = arith.constant 0 : index
      %c0_21 = arith.constant 0 : index
      %50 = vector.load %arg5[%c0_20, %c0_21] : memref<1x1xf32, #tpu.memory_space<vmem>>, vector<1x1xf32>
      tpu.vector_store %arg5[%c0_20, %c0_21], %49 {strides = array<i32>} : memref<1x1xf32, #tpu.memory_space<vmem>>, vector<1x1xf32>,
    } else {
    }
    %c0 = arith.constant 0 : index
    %c0_1 = arith.constant 0 : index
    %3 = vector.load %arg1[%c0, %c0_1] : memref<16x16xbf16, #tpu.memory_space<vmem>>, vector<16x16xbf16>
    %4 = arith.extf %3 : vector<16x16xbf16> to vector<16x16xf32>
    %cst = arith.constant dense<0xFF800000> : vector<16xf32>
    %5 = vector.multi_reduction <maximumf>, %4, %cst [1] : vector<16x16xf32> to vector<16xf32>
    %6 = vector.shape_cast %5 : vector<16xf32> to vector<16x1xf32>
    %7 = vector.broadcast %6 : vector<16x1xf32> to vector<16x16xf32>
    %8 = arith.subf %4, %7 : vector<16x16xf32>
    %9 = math.exp %8 : vector<16x16xf32>
    %cst_2 = arith.constant dense<0.000000e+00> : vector<16xf32>
    %10 = vector.multi_reduction <add>, %9, %cst_2 [1] : vector<16x16xf32> to vector<16xf32>
    %11 = vector.shape_cast %10 : vector<16xf32> to vector<16x1xf32>
    %12 = tpu.iota {dimensions = array<i32: 1>} : vector<16x16xi32>
    %c0_3 = arith.constant 0 : index
    %c0_4 = arith.constant 0 : index
    %13 = vector.load %arg2[%c0_3, %c0_4] : memref<16x1xi32, #tpu.memory_space<vmem>>, vector<16x1xi32>
    %14 = vector.broadcast %13 : vector<16x1xi32> to vector<16x16xi32>
    %15 = arith.cmpi eq, %12, %14 : vector<16x16xi32>
    %cst_5 = arith.constant 0.000000e+00 : f32
    %16 = vector.broadcast %cst_5 : f32 to vector<16x16xf32>
    %17 = arith.select %15, %9, %16 : vector<16x16xi1>, vector<16x16xf32>
    %cst_6 = arith.constant dense<0.000000e+00> : vector<16xf32>
    %18 = vector.multi_reduction <add>, %17, %cst_6 [1] : vector<16x16xf32> to vector<16xf32>
    %19 = vector.shape_cast %18 : vector<16xf32> to vector<16x1xf32>
    %20 = tpu.reciprocal %11 {approx = true} : vector<16x1xf32> -> vector<16x1xf32>
    %21 = arith.mulf %19, %20 : vector<16x1xf32>
    %c0_7 = arith.constant 0 : index
    %c0_8 = arith.constant 0 : index
    %22 = vector.load %arg3[%c0_7, %c0_8] : memref<16x1xf32, #tpu.memory_space<vmem>>, vector<16x1xf32>
    %cst_9 = arith.constant 0.699999988 : f32
    %23 = vector.broadcast %cst_9 : f32 to vector<16x1xf32>
    %24 = math.powf %21, %23 : vector<16x1xf32>
    %cst_10 = arith.constant 0.615572214 : f32
    %25 = vector.broadcast %cst_10 : f32 to vector<16x1xf32>
    %26 = arith.subf %25, %24 : vector<16x1xf32>
    %cst_11 = arith.constant 1.42857146 : f32
    %27 = vector.broadcast %cst_11 : f32 to vector<16x1xf32>
    %28 = arith.mulf %26, %27 : vector<16x1xf32>
    %29 = arith.mulf %22, %28 : vector<16x1xf32>
    %c16_i32 = arith.constant 16 : i32
    %30 = arith.muli %arg0, %c16_i32 : i32
    %31 = tpu.iota {dimensions = array<i32: 0>} : vector<16x1xi32>
    %32 = vector.broadcast %30 : i32 to vector<16x1xi32>
    %33 = arith.addi %32, %31 : vector<16x1xi32>
    %c20_i32 = arith.constant 20 : i32
    %34 = vector.broadcast %c20_i32 : i32 to vector<16x1xi32>
    %35 = arith.cmpi slt, %33, %34 : vector<16x1xi32>
    %cst_12 = arith.constant 0.000000e+00 : f32
    %36 = vector.broadcast %cst_12 : f32 to vector<16x1xf32>
    %37 = arith.select %35, %29, %36 : vector<16x1xi1>, vector<16x1xf32>
    %c0_13 = arith.constant 0 : index
    %c0_14 = arith.constant 0 : index
    %38 = vector.load %arg5[%c0_13, %c0_14] : memref<1x1xf32, #tpu.memory_space<vmem>>, vector<1x1xf32>
    %39 = vector.shape_cast %37 : vector<16x1xf32> to vector<1x16x1xf32>
    %cst_15 = arith.constant dense<0.000000e+00> : vector<1xf32>
    %40 = vector.multi_reduction <add>, %39, %cst_15 [1, 2] : vector<1x16x1xf32> to vector<1xf32>
    %41 = vector.shape_cast %40 : vector<1xf32> to vector<1x1x1xf32>
    %42 = vector.extract %41[0, 0, 0] : f32 from vector<1x1x1xf32>
    %43 = vector.broadcast %42 : f32 to vector<1x1xf32>
    %44 = arith.addf %38, %43 : vector<1x1xf32>
    %c0_16 = arith.constant 0 : index
    %c0_17 = arith.constant 0 : index
    %45 = vector.load %arg5[%c0_16, %c0_17] : memref<1x1xf32, #tpu.memory_space<vmem>>, vector<1x1xf32>
    tpu.vector_store %arg5[%c0_16, %c0_17], %44 {strides = array<i32>} : memref<1x1xf32, #tpu.memory_space<vmem>>, vector<1x1xf32>,
    %c1_i32 = arith.constant 1 : i32
    %46 = arith.cmpi eq, %arg0, %c1_i32 : i32
    %47 = arith.extui %46 : i1 to i32
    %c0_i32_18 = arith.constant 0 : i32
    %48 = arith.cmpi ne, %47, %c0_i32_18 : i32
    scf.if %48 {
      %c0_19 = arith.constant 0 : index
      %c0_20 = arith.constant 0 : index
      %49 = vector.load %arg5[%c0_19, %c0_20] : memref<1x1xf32, #tpu.memory_space<vmem>>, vector<1x1xf32>
      %cst_21 = arith.constant 5.000000e-02 : f32
      %50 = vector.broadcast %cst_21 : f32 to vector<1x1xf32>
      %51 = arith.mulf %49, %50 : vector<1x1xf32>
      %c0_22 = arith.constant 0 : index
      %c0_23 = arith.constant 0 : index
      %52 = vector.load %arg4[%c0_22, %c0_23] : memref<1x1xf32, #tpu.memory_space<vmem>>, vector<1x1xf32>
      tpu.vector_store %arg4[%c0_22, %c0_23], %51 {strides = array<i32>} : memref<1x1xf32, #tpu.memory_space<vmem>>, vector<1x1xf32>,
    } else {
    }
    return
  }
  func.func @transform_0(%arg0: i32) -> (i32, i32) {
    %c0_i32 = arith.constant 0 : i32
    %c0_i32_0 = arith.constant 0 : i32
    return %arg0, %c0_i32 : i32, i32
  }
  func.func @transform_1(%arg0: i32) -> (i32, i32) {
    %c0_i32 = arith.constant 0 : i32
    %c0_i32_0 = arith.constant 0 : i32
    return %arg0, %c0_i32 : i32, i32
  }
  func.func @transform_2(%arg0: i32) -> (i32, i32) {
    %c0_i32 = arith.constant 0 : i32
    %c0_i32_0 = arith.constant 0 : i32
    return %arg0, %c0_i32 : i32, i32
  }
  func.func @transform_3(%arg0: i32) -> (i32, i32) {
    %c0_i32 = arith.constant 0 : i32
    %c0_i32_0 = arith.constant 0 : i32
    %c0_i32_1 = arith.constant 0 : i32
    return %c0_i32, %c0_i32_0 : i32, i32
  }
}

</mosaic_0001>

<bundles_post_ra>
// kernel: tpu_custom_call.1
= control target key start
LH: loop header
LB: loop body
LE: loop exit
PB: predicated region body
PF: predicated region fallthrough
CT: control target
= control target key end

     0   :  { %8 = vsyncpa [#allocation4], 0  ;;  %s543_s12 = smov 0   ;;  %s602_s0 = inlined_call_operand.vmem [shape: bf16[32,16], index: 0, kind: input, shape index: {}]   ;;  %s603_s1 = inlined_call_operand.vmem [shape: s32[32,1], index: 1, kind: input, shape index: {}]   ;;  %s604_s2 = inlined_call_operand.vmem [shape: f32[32,1], index: 2, kind: input, shape index: {}]   ;;  %s605_s3 = inlined_call_operand.hbm [shape: f32[1,1], index: 3, kind: output, shape index: {}]  }
   0x1 LB: > { %s549_s13 = sadd.s32 4294967295, %s518_s12   ;;  %p375_p0 = scmp.ge.s32.totalorder %s518_s12, 1  ;;  %s518_s12 = sphi %s543_s12, %s14_s12  }
   0x2   : > { %p156_p1 = scmp.lt.s32.totalorder %s518_s12, 3 }
   0x4   : > { %p157_p2 = pnand %p375_p0, %p156_p1 }
   0x5   : > { %s376_s14 = sshll.u32 (!%p157_p2), %s549_s13, 1  ;;  %p382_p4 = scmp.ne.s32.totalorder (!%p157_p2), %s549_s13, 0 }
   0x6   : > { %160 = sbr.rel (%p157_p2) target bundleno = 625 (0x271), region = 32  ;;  %p186_p3 = scmp.lt.s32.totalorder (!%p157_p2), %s376_s14, 3 }
   0xd   : > { %s607_s14 = smov (!%p186_p3, %s376_s14), 3  ;;  %206 = sbr.rel (%p382_p4) target bundleno = 20 (0x14), region = 36 }
   0xe   : > { %s377_s15 = sshll.u32 %s607_s14, 2  ;;  %s379_s16 = sshll.u32 %s607_s14, 3  ;;  %vm207_vm0 = vcmask (!%p382_p4), 0   ;;  %v520_v0 = vmov (!%p382_p4), 0.0  }
   0xf   : > { %s189_s19 = scalar_lea.vmem %s602_s0, %s377_s15  ;;  %s195_s22 = scalar_lea.vmem %s603_s1, %s379_s16  ;;  %208 = vst.msk [vmem:[#allocation2] sm:$0x1] (!%p382_p4), %vm207_vm0, %v520_v0 }
  0x10   : > { %s563_s25 = scalar_lea.vmem %s604_s2, %s379_s16 }
  0x14 PF: > { %v390_v1 = vld [vmem:[%s189_s19] sm:$0xff]   ;;  %vm213_vm1 = vcmask 130048   ;;  %v521_v5 = vmov 0   ;;  %v235_v7 = vld [vmem:[%s195_s22 + $0x8] sm:$0xff]  ;;  %v232_v14 = vlaneseq  ;;  %s383_s26 = sshll.u32 %s549_s13, 4  ;;  %vm278_vm0 = vcmask 7168  }
  0x15   : > { %v234_v2 = vld [vmem:[%s195_s22] sm:$0xff]  ;;  %v391_v3 = vunpack.c.l.bf16 %v390_v1  ;;  %v392_v4 = vunpack.c.h.bf16 %v390_v1  ;;  %464 = vset.pattern.permute.xlu1 %v521_v5  ;;  %465 = vset.pattern.permute.xlu0 %v521_v5  ;;  %v270_v48 = vstv %s383_s26  ;;  %v257_v63 = vld [vmem:[%s563_s25 + $0x8] sm:$0xff]  ;;  %p384_p5 = scmp.ne.s32.totalorder %s549_s13, 1 }
  0x16   : > { %237 = vperm.xlu1 %464, %v234_v2   ;;  %v233_v17 = vand.u32 127, %v232_v14  ;;  %v268_v44 = vshrl.u32 %v232_v14, 7  ;;  %v256_v54 = vld [vmem:[%s563_s25] sm:$0xff] }
  0x17   : > { %v214_v6 = vsel %vm213_vm1, %v391_v3, -inf  ;;  %v217_v8 = vsel %vm213_vm1, %v392_v4, -inf  ;;  %v277_v14 = vld [vmem:[#allocation2] sm:$0x1] }
  0x18   : > { %215 = vmax.xlane.f32.xlu0 %v214_v6  ;;  %v269_v51 = vadd.s32 8, %v268_v44  ;;  %v271_v56 = vadd.s32 %v270_v48, %v268_v44 }
  0x1a   : > { %240 = vperm.xlu1 %464, %v235_v7   ;;  %v272_v60 = vadd.s32 %v270_v48, %v269_v51  ;;  %vm273_vm14 = vcmp.lt.s32.totalorder %v271_v56, 20 }
  0x1c   : > { %218 = vmax.xlane.f32.xlu0 %v217_v8  ;;  %vm274_vm15 = vcmp.lt.s32.totalorder %v272_v60, 20 }
  0x95   : > { %v238_v16 = vpop.permute.xlu1 %237 }
  0x96   : > { %vm242_vm2 = vcmp.eq.s32.totalorder %v233_v17, %v238_v16 }
  0x99   : > { %v241_v19 = vpop.permute.xlu1 %240 }
  0x9a   : > { %vm243_vm3 = vcmp.eq.s32.totalorder %v233_v17, %v241_v19 }
  0xa5   : > { %v216_v9 = vpop.xlane.xlu0 %215 }
  0xa6   : > { %v220_v10 = vsub.f32 %v391_v3, %v216_v9 }
  0xa8   : > { %v222_v11 = vmul.f32 1.442695, %v220_v10 }
  0xa9   : > { %v219_v12 = vpop.xlane.xlu0 %218 }
  0xaa   : > { %466 = vpow2.f32 %v222_v11  ;;  %v221_v13 = vsub.f32 %v392_v4, %v219_v12 }
  0xac   : > { %v224_v15 = vmul.f32 1.442695, %v221_v13 }
  0xae   : > { %468 = vpow2.f32 %v224_v15 }
  0xb4   : > { %v467_v18 = vpop.eup %466 }
  0xb5   : > { %v226_v20 = vsel %vm213_vm1, %v467_v18, 0.0  ;;  %v244_v21 = vsel %vm242_vm2, %v467_v18, 0.0 }
  0xb6   : > { %227 = vadd.xlane.f32.xlu0 %v226_v20  ;;  %v246_v23 = vsel %vm213_vm1, %v244_v21, 0.0 }
  0xb8   : > { %v469_v22 = vpop.eup %468 }
  0xb9   : > { %v229_v24 = vsel %vm213_vm1, %v469_v22, 0.0  ;;  %v245_v25 = vsel %vm243_vm3, %v469_v22, 0.0 }
  0xba   : > { %247 = vadd.xlane.f32.xlu0 %v246_v23  ;;  %230 = vadd.xlane.f32.xlu1 %v229_v24  ;;  %v249_v26 = vsel %vm213_vm1, %v245_v25, 0.0  ;;  %vm293_vm1 = vcmask 0  }
  0xbe   : > { %250 = vadd.xlane.f32.xlu0 %v249_v26 }
 0x143   : > { %v228_v27 = vpop.xlane.xlu0 %227 }
 0x144   : > { %470 = vrcp.f32 %v228_v27 }
 0x147   : > { %v231_v28 = vpop.xlane.xlu1 %230  ;;  %v248_v29 = vpop.xlane.xlu0 %247 }
 0x148   : > { %472 = vrcp.f32 %v231_v28 }
 0x14b   : > { %v251_v34 = vpop.xlane.xlu0 %250 }
 0x14e   : > { %v471_v30 = vpop.eup %470 }
 0x14f   : > { %v254_v31 = vmul.f32 %v471_v30, %v248_v29 }
 0x151   : > { %v397_v32 = vand.u32 2147483647, %v254_v31  ;;  %vm401_vm4 = vcmp.lt.f32.partialorder %v254_v31, 0  ;;  %vm402_vm5 = vcmp.eq.f32.partialorder %v254_v31, 0  ;;  %vm414_vm7 = vcmp.ne.f32.partialorder %v254_v31, %v254_v31 }
 0x152   : > { %v473_v33 = vpop.eup %472  ;;  %vm403_vm9 = vcmp.eq.f32.partialorder %v254_v31, 1065353216 }
 0x153   : > { %474 = vlog2.f32 %v397_v32  ;;  %v255_v35 = vmul.f32 %v473_v33, %v251_v34  ;;  %vm406_vm6 = vcmp.eq.f32.partialorder %v397_v32, 2139095040 }
 0x155   : > { %v423_v36 = vand.u32 2147483647, %v255_v35  ;;  %vm427_vm8 = vcmp.lt.f32.partialorder %v255_v35, 0  ;;  %vm428_vm10 = vcmp.eq.f32.partialorder %v255_v35, 0  ;;  %vm440_vm12 = vcmp.ne.f32.partialorder %v255_v35, %v255_v35 }
 0x156   : > { %vm429_vm13 = vcmp.eq.f32.partialorder %v255_v35, 1065353216 }
 0x157   : > { %476 = vlog2.f32 %v423_v36  ;;  %vm432_vm11 = vcmp.eq.f32.partialorder %v423_v36, 2139095040 }
 0x15d   : > { %v475_v37 = vpop.eup %474 }
 0x15e   : > { %v399_v38 = vmul.f32 0.7, %v475_v37 }
 0x160   : > { %478 = vpow2.f32 %v399_v38 }
 0x161   : > { %v477_v39 = vpop.eup %476 }
 0x162   : > { %v425_v40 = vmul.f32 0.7, %v477_v39 }
 0x164   : > { %480 = vpow2.f32 %v425_v40 }
 0x16a   : > { %v479_v41 = vpop.eup %478 }
 0x16b   : > { %v407_v42 = vsel %vm401_vm4, 2143289344, %v479_v41 }
 0x16c   : > { %v408_v43 = vsel %vm402_vm5, 0, %v407_v42 }
 0x16d   : > { %v413_v45 = vsel %vm406_vm6, 2139095040, %v408_v43 }
 0x16e   : > { %v481_v46 = vpop.eup %480  ;;  %v417_v47 = vsel %vm414_vm7, 2143289344, %v413_v45 }
 0x16f   : > { %v418_v49 = vsel %vm403_vm9, 1065353216, %v417_v47  ;;  %v433_v50 = vsel %vm427_vm8, 2143289344, %v481_v46 }
 0x170   : > { %v434_v52 = vsel %vm428_vm10, 0, %v433_v50  ;;  %v260_v53 = vsub.f32 0.6155722, %v418_v49 }
 0x171   : > { %v439_v55 = vsel %vm432_vm11, 2139095040, %v434_v52 }
 0x172   : > { %v443_v57 = vsel %vm440_vm12, 2143289344, %v439_v55  ;;  %v262_v58 = vmul.f32 1.4285715, %v260_v53 }
 0x173   : > { %v444_v59 = vsel %vm429_vm13, 1065353216, %v443_v57 }
 0x174   : > { %v261_v61 = vsub.f32 0.6155722, %v444_v59  ;;  %v264_v62 = vmul.f32 %v262_v58, %v256_v54 }
 0x176   : > { %v263_v0 = vmul.f32 1.4285715, %v261_v61  ;;  %v275_v2 = vsel %vm273_vm14, %v264_v62, 0.0 }
 0x177   : > { %v279_v4 = vsel %vm278_vm0, %v275_v2, 0.0 }
 0x178   : > { %v265_v1 = vmul.f32 %v263_v0, %v257_v63 }
 0x17a   : > { %v276_v3 = vsel %vm274_vm15, %v265_v1, 0.0 }
 0x17b   : > { %v280_v5 = vsel %vm278_vm0, %v276_v3, 0.0 }
 0x17c   : > { %v281_v6 = vadd.f32 %v280_v5, %v279_v4 }
 0x17e   : > { %282 = vadd.xlane.f32.xlu0 %v281_v6 }
 0x20b   : > { %v283_v7 = vpop.xlane.xlu0 %282 }
 0x20c   : > { %v284_v8 = vrot.slane %v283_v7, 4 }
 0x20e   : > { %v285_v9 = vadd.f32 %v284_v8, %v283_v7 }
 0x210   : > { %v286_v10 = vrot.slane %v285_v9, 2 }
 0x212   : > { %v287_v11 = vadd.f32 %v286_v10, %v285_v9 }
 0x214   : > { %v288_v12 = vrot.slane %v287_v11, 1 }
 0x216   : > { %v289_v13 = vadd.f32 %v288_v12, %v287_v11 }
 0x218   : > { %445 = vpush %v289_v13 }
 0x247   : > { %298 = sbr.rel (%p384_p5) target bundleno = 600 (0x258), region = 40 }
 0x249   : > { %s446_s27 = spop %445 }
 0x24a   : > { %v291_v15 = vstv %s446_s27 }
 0x24b   : > { %v292_v16 = vadd.f32 %v291_v15, %v277_v14 }
 0x24d   : > { %294 = vst.msk [vmem:[#allocation2] sm:$0x1] %vm293_vm1, %v292_v16 }
 0x254   : > { %v299_v17 = vld [vmem:[#allocation2] sm:$0x1] }
 0x255   : > { %v300_v18 = vmul.f32 0.05, %v299_v17 }
 0x257   : > { %301 = vst.msk [vmem:[#allocation3] sm:$0x1] %vm293_vm1, %v300_v18 }
 0x258 PF: > { %p451_p6 = scmp.eq.s32.totalorder %s549_s13, 1  ;;  %s522_s28 = smov [#allocation3]  }
 0x259   : > { %s309_s29 = sshll.u32 %s522_s28, 4  ;;  %s310_s29 = int_to_ptr.vmem [resolvable:$true] %s309_s29 }
 0x25a   : > { %s482_s30 = scalar_lea.vmem %s310_s29, 16  ;;  %s488_s4 = scalar_lea.vmem %s310_s29, 32 }
 0x25b   : > { %p483_p7 = scmp.ne.s32.totalorder %s310_s29, %s482_s30  ;;  %p489_p10 = scmp.lt.s32.totalorder %s310_s29, %s310_s29 }
 0x25c   : > { %p490_p11 = scmp.lt.s32.totalorder %s488_s4, %s482_s30 }
 0x25d   : > { %p484_p8 = pnand %p483_p7, %p451_p6 }
 0x25e   : > { %p491_p12 = por %p490_p11, %p489_p10 }
 0x25f   : > { %p485_p9 = pneg %p484_p8 }
 0x261   : > { %p492_p13 = pnand %p491_p12, %p485_p9 }
 0x263   : > { %495 = shalt.err (!%p492_p13)
}
 0x264   : > { %s496_s7 = scalar_lea.hbm %s605_s3, 16 }
 0x265   : > { %p497_p0 = scmp.ne.s32.totalorder %s605_s3, %s496_s7  ;;  %p502_p3 = scmp.lt.u32.totalorder %s496_s7, %s605_s3 }
 0x267   : > { %p498_p1 = pnand %p497_p0, %p451_p6 }
 0x269   : > { %p499_p2 = pneg %p498_p1 }
 0x26b   : > { %p504_p4 = pnand %p502_p3, %p499_p2 }
 0x26d   : > { %507 = shalt.err (!%p504_p4)
}
 0x26e   : > { %448 = dma.vmem_to_hbm [thread:$0]  (%p451_p6), %s310_s29, 16, %s605_s3, [#allocation4]  }
 0x26f   : > { %513 = dma.done.wait (%p451_p6), [#allocation4], 16  }
 0x270   : > { %515 = vsyncadd (%p451_p6), [#allocation4], 4294967280 }
 0x271 PF: > { %s14_s12 = sadd.s32 1, %s518_s12  }
 0x272   : > { %p11_p5 = scmp.ge.s32.totalorder %s14_s12, 4  }
 0x274   :  { %13 = sbr.rel (!%p11_p5) target bundleno = 1 (0x1), region = 73 }
 0x27b   :  { %322 = vsyncpa [#allocation4], 1 }
 0x27c   :  { %324 = vsyncpa [#allocation4 + $0x1], 1 }

</bundles_post_ra>
